<compile_context>
chip_gen: v7x
topology: tpu7x:2x2x1
jax: 0.10.0
libtpu: 0.0.40
codegen_flags: <defaults>
</compile_context>

<pallas_src>
import jax
import jax.numpy as jnp
from jax.experimental import pallas as pl
from jax.experimental.pallas import tpu as pltpu

_LANE = 128
_SUBLANE = 8
_MIN_PALLAS_ELEMS = 8 * 128                 # below one f32 vreg, XLA wins
_TARGET_BLOCK_BYTES = 4 * 1024 * 1024       # ~4 MiB block; x2 arrays x2 buffers ~16 MiB
_VMEM_LIMIT_BYTES = 32 * 1024 * 1024        # explicit, safe on v5e/v6e/v7x
_FALLBACK_BLOCK_CAP = 8 * 1024 * 1024       # max single block in the ragged path


def _relu_kernel(x_ref, o_ref):
    o_ref[...] = jnp.maximum(x_ref[...], jnp.zeros((), dtype=x_ref.dtype))


_COL_CANDIDATES = (32768, 16384, 8192, 4096, 2048, 1024, 512, 384, 256, 128)


def _lane_dense_view(n):
    """Pick (rows, cols) with cols a large multiple of 128 dividing n.
    Prefer the largest cols that also makes rows a multiple of 8 (full vregs);
    otherwise take the largest dividing cols. Returns None if no candidate."""
    best = None
    for c in _COL_CANDIDATES:
        if n % c == 0:
            r = n // c
            if r % _SUBLANE == 0:
                return r, c
            if best is None:
                best = (r, c)
    return best


def _row_multiple(dtype):
    """Tile-row granularity so packed sub-32-bit dtypes keep whole sublane
    groups: 8 for 32-bit, 16 for bf16/fp16, 32 for int8/fp8."""
    itemsize = jnp.dtype(dtype).itemsize
    packing = max(1, 4 // itemsize)
    return _SUBLANE * packing


def _choose_tile_rows(rows, cols, dtype):
    """Block height targeting ~4 MiB blocks, aligned to the sublane group."""
    itemsize = jnp.dtype(dtype).itemsize
    m = _row_multiple(dtype)
    tr = max(1, _TARGET_BLOCK_BYTES // (cols * itemsize))
    if tr >= rows:
        return rows                          # single full-height block
    tr = max(m, (tr // m) * m)
    return min(tr, rows)


def _relu_pallas_tiled(x2):
    rows, cols = x2.shape
    tile_rows = _choose_tile_rows(rows, cols, x2.dtype)
    grid = (pl.cdiv(rows, tile_rows),)
    return pl.pallas_call(
        _relu_kernel,
        out_shape=jax.ShapeDtypeStruct((rows, cols), x2.dtype),
        grid=grid,
        in_specs=[pl.BlockSpec((tile_rows, cols), lambda i: (i, 0))],
        out_specs=pl.BlockSpec((tile_rows, cols), lambda i: (i, 0)),
        compiler_params=pltpu.CompilerParams(
            dimension_semantics=("parallel",),
            vmem_limit_bytes=_VMEM_LIMIT_BYTES,
        ),
    )(x2)


def relu_pallas(x):
    """ReLU as a Pallas TPU kernel. Any rank, preserves shape/dtype."""
    orig_shape = x.shape
    n = x.size
    if n == 0:
        return x

    # Tiny inputs: kernel launch + DMA setup dwarfs the work; use fused XLA op.
    if n < _MIN_PALLAS_ELEMS:
        return jnp.maximum(x, jnp.zeros((), dtype=x.dtype))

    view = _lane_dense_view(n)
    if view is not None:
        rows, cols = view
        out = _relu_pallas_tiled(x.reshape(rows, cols))
        return out.reshape(orig_shape)

    # Total size not a multiple of 128: keep the original last dim as lanes
    # and tile the flattened leading dims (masked lane stores, still one
    # streaming Pallas pass).
    x2 = x.reshape(1, -1) if x.ndim < 2 else x.reshape(-1, orig_shape[-1])
    rows, cols = x2.shape
    min_block_bytes = cols * x2.dtype.itemsize * min(rows, _row_multiple(x2.dtype))
    if min_block_bytes > _FALLBACK_BLOCK_CAP:
        # even a minimum-height block would blow VMEM; let XLA stream it
        return jnp.maximum(x, jnp.zeros((), dtype=x.dtype))
    out = _relu_pallas_tiled(x2)
    return out.reshape(orig_shape)


if __name__ == "__main__":
    # exact example from the PyTorch script: [[1, -0.5], [-1, 3]]
    x_small = jnp.array([[1.0, -0.5], [-1.0, 3.0]], dtype=jnp.float32)
    y_small = jax.block_until_ready(relu_pallas(x_small))
    assert jnp.array_equal(y_small, jnp.maximum(x_small, 0.0)), "small-case mismatch"

    # deterministic random input at the module-consistent small shape
    key = jax.random.PRNGKey(0)
    x = jax.random.normal(key, (2, 4, 16, 16), dtype=jnp.float32)
    y = jax.block_until_ready(relu_pallas(x))
    assert y.shape == x.shape and y.dtype == x.dtype
    assert jnp.array_equal(y, jnp.maximum(x, 0.0)), "random-case mismatch"

    # larger lane-dense case exercising the multi-step tiled (double-buffered,
    # "parallel") path: 2M f32 elems -> (64, 32768), 32-row tiles, grid=2
    x_big = jax.random.normal(jax.random.PRNGKey(1), (16, 8, 128, 128),
                              dtype=jnp.float32)
    y_big = jax.block_until_ready(relu_pallas(x_big))
    assert jnp.array_equal(y_big, jnp.maximum(x_big, 0.0)), "tiled-case mismatch"

    # bf16 path (packed sublanes; tile rows stay a multiple of 16)
    x_bf = x_big.astype(jnp.bfloat16)
    y_bf = jax.block_until_ready(relu_pallas(x_bf))
    assert y_bf.dtype == jnp.bfloat16
    assert jnp.array_equal(y_bf, jnp.maximum(x_bf, jnp.zeros((), jnp.bfloat16))), \
        "bf16-case mismatch"

    # ragged case (total not a multiple of 128): tiled fallback path
    x_rag = jax.random.normal(jax.random.PRNGKey(2), (48, 100), dtype=jnp.float32)
    y_rag = jax.block_until_ready(relu_pallas(x_rag))
    assert jnp.array_equal(y_rag, jnp.maximum(x_rag, 0.0)), "ragged-case mismatch"

    print("KERNEL_OK")
</pallas_src>

<mosaic_0001>
module attributes {stable_mosaic.version = 11 : i64} {
  func.func @_relu_kernel(%arg0: i32, %arg1: memref<8x256xf32, #tpu.memory_space<vmem>>, %arg2: memref<8x256xf32, #tpu.memory_space<vmem>>) attributes {dimension_semantics = [#tpu.dimension_semantics<parallel>], iteration_bounds = array<i64: 1>, scalar_prefetch = 0 : i64, scratch_operands = 0 : i64, tpu.core_type = #tpu.core_type<tc>, window_params = [{transform_indices = @transform_0, window_bounds = array<i64: 8, 256>}, {transform_indices = @transform_1, window_bounds = array<i64: 8, 256>}]} {
    %c0 = arith.constant 0 : index
    %c0_0 = arith.constant 0 : index
    %0 = vector.load %arg1[%c0, %c0_0] : memref<8x256xf32, #tpu.memory_space<vmem>>, vector<8x256xf32>
    %cst = arith.constant 0.000000e+00 : f32
    %1 = vector.broadcast %cst : f32 to vector<8x256xf32>
    %2 = arith.maximumf %0, %1 : vector<8x256xf32>
    %c0_1 = arith.constant 0 : index
    %c0_2 = arith.constant 0 : index
    %3 = vector.load %arg2[%c0_1, %c0_2] : memref<8x256xf32, #tpu.memory_space<vmem>>, vector<8x256xf32>
    tpu.vector_store %arg2[%c0_1, %c0_2], %2 {strides = array<i32>} : memref<8x256xf32, #tpu.memory_space<vmem>>, vector<8x256xf32>,
    return
  }
  func.func @transform_0(%arg0: i32) -> (i32, i32) {
    %c0_i32 = arith.constant 0 : i32
    %c0_i32_0 = arith.constant 0 : i32
    return %arg0, %c0_i32 : i32, i32
  }
  func.func @transform_1(%arg0: i32) -> (i32, i32) {
    %c0_i32 = arith.constant 0 : i32
    %c0_i32_0 = arith.constant 0 : i32
    return %arg0, %c0_i32 : i32, i32
  }
}

</mosaic_0001>

<bundles_post_ra>
// kernel: tpu_custom_call.1
= control target key start
LH: loop header
LB: loop body
LE: loop exit
PB: predicated region body
PF: predicated region fallthrough
CT: control target
= control target key end

     0   :  { %6 = vsyncpa [#allocation3], 0  ;;  %s128_s0 = inlined_call_operand.hbm [shape: f32[8,256], index: 0, kind: input, shape index: {}]   ;;  %s129_s1 = inlined_call_operand.hbm [shape: f32[8,256], index: 1, kind: output, shape index: {}]  }
   0x1   :  { %7 = vsyncpa [#allocation4], 0  ;;  %s92_s6 = smov [#allocation2]   ;;  %s44_s10 = scalar_lea.hbm %s128_s0, 256 }
   0x2   :  { %s14_s7 = sshll.u32 %s92_s6, 4  ;;  %p45_p0 = scmp.ne.s32.totalorder %s128_s0, %s44_s10  ;;  %s15_s7 = int_to_ptr.vmem [resolvable:$true] %s14_s7 }
   0x3   :  { %p48_p1 = scmp.lt.u32.totalorder %s44_s10, %s128_s0 }
   0x5   :  { %p50_p2 = pnand %p48_p1, %p45_p0 }
   0x7   :  { %53 = shalt.err (!%p50_p2)
}
   0x8   :  { %s54_s15 = scalar_lea.vmem %s15_s7, 256  ;;  %p59_p4 = scmp.lt.s32.totalorder %s15_s7, %s15_s7 }
   0x9   :  { %p55_p3 = scmp.ne.s32.totalorder %s15_s7, %s54_s15  ;;  %p60_p5 = scmp.lt.s32.totalorder %s54_s15, %s54_s15 }
   0xb   :  { %p61_p6 = por %p60_p5, %p59_p4 }
   0xd   :  { %p62_p7 = pnand %p61_p6, %p55_p3 }
   0xf   :  { %65 = shalt.err (!%p62_p7)
}
  0x10   :  { %17 = dma.hbm_to_vmem [thread:$0]  %s128_s0, 256, %s15_s7, [#allocation3]  }
  0x11   :  { %88 = dma.done.wait [#allocation3], 256  }
  0x12   :  { %89 = vsyncadd [#allocation3], 4294967040  ;;  %s93_s18 = smov [#allocation5]   ;;  %v21_v0 = vld [vmem:[#allocation2] sm:$0xff]  ;;  %v22_v1 = vld [vmem:[#allocation2 + $0x8] sm:$0xff] }
  0x13   :  { %s33_s19 = sshll.u32 %s93_s18, 4  ;;  %v23_v2 = vmax.f32 %v21_v0, 0.0  ;;  %v24_v3 = vmax.f32 %v22_v1, 0.0  ;;  %s34_s19 = int_to_ptr.vmem [resolvable:$true] %s33_s19 }
  0x14   :  { %s66_s20 = scalar_lea.vmem %s34_s19, 256  ;;  %p71_p9 = scmp.lt.s32.totalorder %s34_s19, %s34_s19 }
  0x15   :  { %25 = vst [vmem:[#allocation5] sm:$0xff] %v23_v2  ;;  %26 = vst [vmem:[#allocation5 + $0x8] sm:$0xff] %v24_v3  ;;  %p67_p8 = scmp.ne.s32.totalorder %s34_s19, %s66_s20  ;;  %p72_p10 = scmp.lt.s32.totalorder %s66_s20, %s66_s20 }
  0x17   :  { %p73_p11 = por %p72_p10, %p71_p9 }
  0x19   :  { %p74_p12 = pnand %p73_p11, %p67_p8 }
  0x1b   :  { %77 = shalt.err (!%p74_p12)
}
  0x1c   :  { %s78_s22 = scalar_lea.hbm %s129_s1, 256 }
  0x1d   :  { %p79_p13 = scmp.ne.s32.totalorder %s129_s1, %s78_s22  ;;  %p82_p0 = scmp.lt.u32.totalorder %s78_s22, %s129_s1 }
  0x1f   :  { %p84_p1 = pnand %p82_p0, %p79_p13 }
  0x21   :  { %87 = shalt.err (!%p84_p1)
}
  0x22   :  { %36 = dma.vmem_to_hbm [thread:$0]  %s34_s19, 256, %s129_s1, [#allocation4]  }
  0x23   :  { %90 = dma.done.wait [#allocation4], 256  }
  0x24   :  { %91 = vsyncadd [#allocation4], 4294967040 }
  0x25   :  { %40 = vsyncpa [#allocation3], 1 }
  0x26   :  { %41 = vsyncpa [#allocation4], 1 }

</bundles_post_ra>
